<compile_context>
chip_gen: v6e
topology: v6e:2x2x1
jax: 0.10.0
libtpu: 0.0.40
codegen_flags: <defaults>
</compile_context>

<pallas_src>
import functools
import math

import jax
import jax.numpy as jnp
from jax.experimental import pallas as pl
from jax.experimental.pallas import tpu as pltpu


def _regularizer_kernel(scale_ref, x_ref, o_ref):
    # scale_ref: (1,) f32 parameter in SMEM
    # x_ref / o_ref: (tm, cols) tiles in VMEM
    o_ref[...] = (x_ref[...].astype(jnp.float32) * scale_ref[0]).astype(o_ref.dtype)


def _round_up(a, b):
    return -(-a // b) * b


@functools.partial(jax.jit, static_argnames=("target_tile_bytes",))
def regularizer_forward(x, reg_param, *, target_tile_bytes=4 * 1024 * 1024):
    """out = x * reg_param  (reg_param is a shape-(1,) learnable scalar)."""
    orig_shape = x.shape
    in_dtype = x.dtype
    out_dtype = jnp.promote_types(in_dtype, reg_param.dtype)

    n = math.prod(orig_shape) if orig_shape else 1
    item = max(jnp.dtype(in_dtype).itemsize, jnp.dtype(out_dtype).itemsize)
    # dtype-aware native sublane packing: f32 -> 8, bf16 -> 16, int8/fp8 -> 32
    sublane = {4: 8, 2: 16, 1: 32}.get(jnp.dtype(in_dtype).itemsize, 8)

    # Lane-dense column width: prefer the widest multiple of 128 that divides n
    # exactly (no padding copy); otherwise fall back to 1024 columns + a single pad.
    cols = 1024
    for c in (1024, 512, 256, 128):
        if n % c == 0:
            cols = c
            break

    rows = -(-n // cols)  # rows needed to hold all elements in a (rows, cols) slab

    # Row tile sized for ~target_tile_bytes per block.  With input + output each
    # double-buffered that is ~4x target_tile_bytes of VMEM (~16 MiB at default),
    # which fits v7x's 64 MiB VMEM as well as v5e/v6e's 128 MiB.
    tm_budget = max(sublane, (target_tile_bytes // (cols * item)) // sublane * sublane)

    if rows <= tm_budget:
        # Single block covering the whole slab: block_shape == array shape, so the
        # (8,128) divisibility requirement does not apply and no row padding is
        # needed beyond filling the last `cols`-wide row.
        tm = rows
        rows_padded = rows
    else:
        tm = tm_budget
        # Prefer >= 2 grid steps so both v7x TensorCores get work (free on v5e/v6e).
        if rows < 2 * tm:
            tm = _round_up(-(-rows // 2), sublane)
        rows_padded = _round_up(rows, tm)  # never shrink the tile; pad a few rows instead

    total = rows_padded * cols

    flat = x.reshape(-1)
    if total != n:
        flat = jnp.pad(flat, (0, total - n))  # single pad, only when the shape demands it
    slab = flat.reshape(rows_padded, cols)

    scale = reg_param.astype(jnp.float32).reshape((1,))

    grid = (rows_padded // tm,)

    out_slab = pl.pallas_call(
        _regularizer_kernel,
        out_shape=jax.ShapeDtypeStruct((rows_padded, cols), out_dtype),
        grid_spec=pltpu.PrefetchScalarGridSpec(
            num_scalar_prefetch=0,
            grid=grid,
            in_specs=[
                pl.BlockSpec(memory_space=pltpu.SMEM),       # scalar parameter (f32)
                pl.BlockSpec((tm, cols), lambda i: (i, 0)),  # input row tile
            ],
            out_specs=pl.BlockSpec((tm, cols), lambda i: (i, 0)),
        ),
        compiler_params=pltpu.CompilerParams(
            dimension_semantics=("parallel",),
            vmem_limit_bytes=40 * 1024 * 1024,  # above v5e's 16 MiB scoped default, < v7x physical
        ),
    )(scale, slab)

    out_flat = out_slab.reshape(-1)
    if total != n:
        out_flat = out_flat[:n]
    return out_flat.reshape(orig_shape)


class Regularizer:
    """JAX/Pallas port of the PyTorch Regularizer module (forward pass only)."""

    def __init__(self, default_val=1e-07, n_comps=60):
        # deterministic parameter init, matching torch.tensor([default_val])
        self.Regularizer = jnp.array([default_val], dtype=jnp.float32)

    def __call__(self, x):
        return regularizer_forward(x, self.Regularizer)


if __name__ == "__main__":
    key = jax.random.PRNGKey(0)
    # NCHW input, small shapes: batch=2, channels=4, spatial=16x16
    x = jax.random.normal(key, (2, 4, 16, 16), dtype=jnp.float32)

    module = Regularizer(default_val=1e-07, n_comps=60)
    out = module(x)
    out = jax.block_until_ready(out)

    # correctness check against plain JAX reference
    ref = x * module.Regularizer
    assert out.shape == x.shape and out.dtype == x.dtype
    assert jnp.allclose(out, ref, rtol=1e-6, atol=1e-6)

    # also exercise a non-lane-divisible shape to cover the padding path
    y = jax.random.normal(jax.random.PRNGKey(1), (3, 5, 7), dtype=jnp.float32)
    out2 = jax.block_until_ready(module(y))
    assert jnp.allclose(out2, y * module.Regularizer, rtol=1e-6, atol=1e-6)

    print("KERNEL_OK")
</pallas_src>

<mosaic_0001>
module attributes {stable_mosaic.version = 11 : i64} {
  func.func @_regularizer_kernel(%arg0: i32, %arg1: memref<1xf32, #tpu.memory_space<smem>>, %arg2: memref<2x1024xf32, #tpu.memory_space<vmem>>, %arg3: memref<2x1024xf32, #tpu.memory_space<vmem>>) attributes {dimension_semantics = [#tpu.dimension_semantics<parallel>], iteration_bounds = array<i64: 1>, scalar_prefetch = 0 : i64, scratch_operands = 0 : i64, tpu.core_type = #tpu.core_type<tc>, window_params = [{transform_indices = @transform_0, window_bounds = array<i64: 1>}, {transform_indices = @transform_1, window_bounds = array<i64: 2, 1024>}, {transform_indices = @transform_2, window_bounds = array<i64: 2, 1024>}]} {
    %c0 = arith.constant 0 : index
    %c0_0 = arith.constant 0 : index
    %0 = vector.load %arg2[%c0, %c0_0] : memref<2x1024xf32, #tpu.memory_space<vmem>>, vector<2x1024xf32>
    %c0_1 = arith.constant 0 : index
    %1 = memref.load %arg1[%c0_1] : memref<1xf32, #tpu.memory_space<smem>>
    %2 = vector.broadcast %1 : f32 to vector<2x1024xf32>
    %3 = arith.mulf %0, %2 : vector<2x1024xf32>
    %c0_2 = arith.constant 0 : index
    %c0_3 = arith.constant 0 : index
    %4 = vector.load %arg3[%c0_2, %c0_3] : memref<2x1024xf32, #tpu.memory_space<vmem>>, vector<2x1024xf32>
    tpu.vector_store %arg3[%c0_2, %c0_3], %3 {strides = array<i32>} : memref<2x1024xf32, #tpu.memory_space<vmem>>, vector<2x1024xf32>,
    return
  }
  func.func @transform_0(%arg0: i32) -> i32 {
    %c0_i32 = arith.constant 0 : i32
    %c0_i32_0 = arith.constant 0 : i32
    return %c0_i32 : i32
  }
  func.func @transform_1(%arg0: i32) -> (i32, i32) {
    %c0_i32 = arith.constant 0 : i32
    %c0_i32_0 = arith.constant 0 : i32
    return %arg0, %c0_i32 : i32, i32
  }
  func.func @transform_2(%arg0: i32) -> (i32, i32) {
    %c0_i32 = arith.constant 0 : i32
    %c0_i32_0 = arith.constant 0 : i32
    return %arg0, %c0_i32 : i32, i32
  }
}

</mosaic_0001>

<bundles_post_ra>
// kernel: regularizer_forward.1
= control target key start
LH: loop header
LB: loop body
LE: loop exit
PB: predicated region body
PF: predicated region fallthrough
CT: control target
= control target key end

     0   :  { %s54_s0 = inlined_call_operand.<no memory space> [shape: f32[1], index: 0, kind: input, shape index: {}]   ;;  %s55_s1 = inlined_call_operand.vmem [shape: f32[2,1024], index: 1, kind: input, shape index: {}]   ;;  %s56_s2 = inlined_call_operand.vmem [shape: f32[2,1024], index: 2, kind: output, shape index: {}]  }
   0x1   :  { %v12_v0 = vld [vmem:[%s55_s1] sm:$0xff]  ;;  %v15_v1 = vstv %s54_s0  ;;  %v13_v2 = vld [vmem:[%s55_s1 + $0x8] sm:$0xff] }
   0x2   :  { %v16_v3 = vmul.f32 %v15_v1, %v12_v0  ;;  %v17_v4 = vmul.f32 %v15_v1, %v13_v2 }
   0x4   :  { %18 = vst [vmem:[%s56_s2] sm:$0xff] %v16_v3  ;;  %19 = vst [vmem:[%s56_s2 + $0x8] sm:$0xff] %v17_v4 }

</bundles_post_ra>
